<compile_context>
chip_gen: v7x
topology: tpu7x:2x2x1
jax: 0.10.0
libtpu: 0.0.40
codegen_flags: <defaults>
</compile_context>

<pallas_src>
import jax
import jax.numpy as jnp
from jax import lax
from jax.experimental import pallas as pl
from jax.experimental.pallas import tpu as pltpu

EPS = 1e-3


# --------------------------------------------------------------------------
# Pallas kernel: one (Cout, TILE_S) output tile = matmul + BN affine + ReLU
# --------------------------------------------------------------------------
def conv1x1_bn_relu_kernel(x_ref, w_ref, scale_ref, shift_ref, o_ref):
    # x: (Cin, TILE_S) f32      w: (Cout, Cin) bf16 (VMEM-resident)
    # scale/shift: (Cout, 1) f32   o: (Cout, TILE_S) f32
    x_bf = x_ref[...].astype(jnp.bfloat16)                       # free VPU cast
    acc = jnp.dot(w_ref[...], x_bf, preferred_element_type=jnp.float32)
    y = acc * scale_ref[...] + shift_ref[...]                    # BN in f32 epilogue
    o_ref[...] = jnp.maximum(y, 0.0).astype(o_ref.dtype)


def _round_up(x, m):
    return (x + m - 1) // m * m


# --------------------------------------------------------------------------
# Wrapper (layout, BN fold, pallas_call)
# --------------------------------------------------------------------------
def conv_dw_1x1(x_nchw, w, gamma, beta, running_mean, running_var,
                *, eps=EPS, tile_s=1024):
    """CONV_DW_1x1.forward: y = relu(bn(conv_1x1(x))), inference BN.

    x_nchw: (N, Cin, H, W) f32
    w:      (Cout, Cin) f32   (PyTorch 1x1 conv weight with the 1x1 dims squeezed)
    Returns (N, Cout, H, W) f32 (NCHW, same as the PyTorch module).
    """
    N, Cin, H, W = x_nchw.shape
    Cout = w.shape[0]
    S = H * W

    # BatchNorm2d (inference) as a per-output-channel affine.
    # TODO(synk): training-mode BatchNorm (batch statistics / momentum update)
    # is not implemented; inference running-statistics semantics are used.
    scale = (gamma / jnp.sqrt(running_var + eps)).astype(jnp.float32)   # (Cout,)
    shift = (beta - running_mean * scale).astype(jnp.float32)           # (Cout,)
    scale2d = scale.reshape(Cout, 1)
    shift2d = shift.reshape(Cout, 1)

    # Weight is tiny -> cast once to bf16; it stays VMEM-resident in the kernel.
    w_bf = w.astype(jnp.bfloat16)                                       # (Cout, Cin)

    # NCHW -> (N, Cin, S): free contiguous reshape, no transpose.
    x_ncs = x_nchw.reshape(N, Cin, S)

    # Spatial tiling: lane axis must be a multiple of 128.  Only pad in the
    # ragged case (S not a multiple of the chosen tile); padded columns are
    # sliced off after the call.
    tile_s_eff = min(tile_s, _round_up(S, 128))
    Sp = _round_up(S, tile_s_eff)
    if Sp != S:
        x_ncs = jnp.pad(x_ncs, ((0, 0), (0, 0), (0, Sp - S)))

    grid = (N, Sp // tile_s_eff)

    out = pl.pallas_call(
        conv1x1_bn_relu_kernel,
        out_shape=jax.ShapeDtypeStruct((N, Cout, Sp), jnp.float32),
        grid_spec=pltpu.PrefetchScalarGridSpec(
            num_scalar_prefetch=0,
            grid=grid,
            in_specs=[
                # activation tile: batch squeezed, full Cin, lane-dense spatial tile
                pl.BlockSpec((None, Cin, tile_s_eff), lambda n, s: (n, 0, s)),
                # folded weight + BN affine: constant block index -> stays resident
                pl.BlockSpec((Cout, Cin), lambda n, s: (0, 0)),
                pl.BlockSpec((Cout, 1), lambda n, s: (0, 0)),
                pl.BlockSpec((Cout, 1), lambda n, s: (0, 0)),
            ],
            out_specs=pl.BlockSpec((None, Cout, tile_s_eff),
                                   lambda n, s: (n, 0, s)),
        ),
        compiler_params=pltpu.CompilerParams(
            # both axes fully parallel -> megacore sharding on v7x's 2 TCs
            dimension_semantics=("parallel", "parallel"),
            # fits v7x's 64 MiB physical VMEM with headroom; ample on v5e/v6e
            vmem_limit_bytes=48 * 1024 * 1024,
        ),
    )(x_ncs, w_bf, scale2d, shift2d)

    if Sp != S:
        out = out[:, :, :S]
    return out.reshape(N, Cout, H, W)


# --------------------------------------------------------------------------
# Pure-JAX reference (f32, HIGHEST precision)
# --------------------------------------------------------------------------
def conv_dw_1x1_reference(x_nchw, w, gamma, beta, running_mean, running_var,
                          eps=EPS):
    scale = gamma / jnp.sqrt(running_var + eps)
    shift = beta - running_mean * scale
    y = jnp.einsum("oc,nchw->nohw", w, x_nchw,
                   precision=lax.Precision.HIGHEST)
    y = y * scale[None, :, None, None] + shift[None, :, None, None]
    return jnp.maximum(y, 0.0)


# --------------------------------------------------------------------------
if __name__ == "__main__":
    # Small shapes consistent with the module: batch=2, 64->256 channels, 16x16.
    N, Cin, Cout, H, W = 2, 64, 256, 16, 16
    # NB: the module's `stride` __init__ arg is unused (conv is k=1, s=1, p=0).

    key = jax.random.PRNGKey(0)
    kx, kw = jax.random.split(key)
    x = jax.random.normal(kx, (N, Cin, H, W), jnp.float32)          # NCHW
    bound = 1.0 / (Cin ** 0.5)   # PyTorch Conv2d default init bound
    w = jax.random.uniform(kw, (Cout, Cin), jnp.float32, -bound, bound)

    # BatchNorm2d __init__ state (inference): gamma=1, beta=0, mean=0, var=1.
    gamma = jnp.ones((Cout,), jnp.float32)
    beta = jnp.zeros((Cout,), jnp.float32)
    running_mean = jnp.zeros((Cout,), jnp.float32)
    running_var = jnp.ones((Cout,), jnp.float32)

    fwd = jax.jit(conv_dw_1x1)
    out = jax.block_until_ready(fwd(x, w, gamma, beta, running_mean, running_var))
    assert out.shape == (N, Cout, H, W), out.shape

    ref = jax.block_until_ready(
        conv_dw_1x1_reference(x, w, gamma, beta, running_mean, running_var))
    max_err = float(jnp.max(jnp.abs(out - ref)))
    # bf16 matmul inputs, f32 accumulation -> loose tolerance vs f32 reference.
    assert jnp.allclose(out, ref, rtol=2e-2, atol=2e-2), ("mismatch", max_err)

    print("KERNEL_OK")
</pallas_src>

<mosaic_0001>
module attributes {stable_mosaic.version = 11 : i64} {
  func.func @conv1x1_bn_relu_kernel(%arg0: i32, %arg1: i32, %arg2: memref<1x64x256xf32, #tpu.memory_space<vmem>>, %arg3: memref<256x64xbf16, #tpu.memory_space<vmem>>, %arg4: memref<256x1xf32, #tpu.memory_space<vmem>>, %arg5: memref<256x1xf32, #tpu.memory_space<vmem>>, %arg6: memref<1x256x256xf32, #tpu.memory_space<vmem>>) attributes {dimension_semantics = [#tpu.dimension_semantics<parallel>, #tpu.dimension_semantics<parallel>], iteration_bounds = array<i64: 2, 1>, scalar_prefetch = 0 : i64, scratch_operands = 0 : i64, tpu.core_type = #tpu.core_type<tc>, window_params = [{transform_indices = @transform_0, window_bounds = array<i64: 1, 64, 256>}, {pipeline_mode = #tpu.pipeline_mode<synchronous>, transform_indices = @transform_1, window_bounds = array<i64: 256, 64>}, {pipeline_mode = #tpu.pipeline_mode<synchronous>, transform_indices = @transform_2, window_bounds = array<i64: 256, 1>}, {pipeline_mode = #tpu.pipeline_mode<synchronous>, transform_indices = @transform_3, window_bounds = array<i64: 256, 1>}, {transform_indices = @transform_4, window_bounds = array<i64: 1, 256, 256>}]} {
    %c0 = arith.constant 0 : index
    %c0_0 = arith.constant 0 : index
    %c0_1 = arith.constant 0 : index
    %0 = vector.load %arg2[%c0, %c0_0, %c0_1] : memref<1x64x256xf32, #tpu.memory_space<vmem>>, vector<1x64x256xf32>
    %1 = vector.shape_cast %0 : vector<1x64x256xf32> to vector<64x256xf32>
    %2 = arith.truncf %1 : vector<64x256xf32> to vector<64x256xbf16>
    %c0_2 = arith.constant 0 : index
    %c0_3 = arith.constant 0 : index
    %3 = vector.load %arg3[%c0_2, %c0_3] : memref<256x64xbf16, #tpu.memory_space<vmem>>, vector<256x64xbf16>
    %cst = arith.constant dense<0.000000e+00> : vector<256x256xf32>
    %4 = tpu.matmul %3, %2, %cst {dimension_numbers = #tpu.dot_dimension_numbers<[1], [0], [0], [1], [0, 0, 1, 1], [], []>} : vector<256x64xbf16>, vector<64x256xbf16>, vector<256x256xf32> -> vector<256x256xf32>
    %c0_4 = arith.constant 0 : index
    %c0_5 = arith.constant 0 : index
    %5 = vector.load %arg4[%c0_4, %c0_5] : memref<256x1xf32, #tpu.memory_space<vmem>>, vector<256x1xf32>
    %6 = vector.broadcast %5 : vector<256x1xf32> to vector<256x256xf32>
    %7 = arith.mulf %4, %6 : vector<256x256xf32>
    %c0_6 = arith.constant 0 : index
    %c0_7 = arith.constant 0 : index
    %8 = vector.load %arg5[%c0_6, %c0_7] : memref<256x1xf32, #tpu.memory_space<vmem>>, vector<256x1xf32>
    %9 = vector.broadcast %8 : vector<256x1xf32> to vector<256x256xf32>
    %10 = arith.addf %7, %9 : vector<256x256xf32>
    %cst_8 = arith.constant 0.000000e+00 : f32
    %11 = vector.broadcast %cst_8 : f32 to vector<256x256xf32>
    %12 = arith.maximumf %10, %11 : vector<256x256xf32>
    %c0_9 = arith.constant 0 : index
    %c0_10 = arith.constant 0 : index
    %c0_11 = arith.constant 0 : index
    %13 = vector.load %arg6[%c0_9, %c0_10, %c0_11] : memref<1x256x256xf32, #tpu.memory_space<vmem>>, vector<1x256x256xf32>
    %14 = vector.shape_cast %13 : vector<1x256x256xf32> to vector<256x256xf32>
    %15 = vector.shape_cast %12 : vector<256x256xf32> to vector<1x256x256xf32>
    tpu.vector_store %arg6[%c0_9, %c0_10, %c0_11], %15 {strides = array<i32>} : memref<1x256x256xf32, #tpu.memory_space<vmem>>, vector<1x256x256xf32>,
    return
  }
  func.func @transform_0(%arg0: i32, %arg1: i32) -> (i32, i32, i32) {
    %c0_i32 = arith.constant 0 : i32
    %c0_i32_0 = arith.constant 0 : i32
    return %arg0, %c0_i32, %arg1 : i32, i32, i32
  }
  func.func @transform_1(%arg0: i32, %arg1: i32) -> (i32, i32) {
    %c0_i32 = arith.constant 0 : i32
    %c0_i32_0 = arith.constant 0 : i32
    %c0_i32_1 = arith.constant 0 : i32
    return %c0_i32, %c0_i32_0 : i32, i32
  }
  func.func @transform_2(%arg0: i32, %arg1: i32) -> (i32, i32) {
    %c0_i32 = arith.constant 0 : i32
    %c0_i32_0 = arith.constant 0 : i32
    %c0_i32_1 = arith.constant 0 : i32
    return %c0_i32, %c0_i32_0 : i32, i32
  }
  func.func @transform_3(%arg0: i32, %arg1: i32) -> (i32, i32) {
    %c0_i32 = arith.constant 0 : i32
    %c0_i32_0 = arith.constant 0 : i32
    %c0_i32_1 = arith.constant 0 : i32
    return %c0_i32, %c0_i32_0 : i32, i32
  }
  func.func @transform_4(%arg0: i32, %arg1: i32) -> (i32, i32, i32) {
    %c0_i32 = arith.constant 0 : i32
    %c0_i32_0 = arith.constant 0 : i32
    return %arg0, %c0_i32, %arg1 : i32, i32, i32
  }
}

</mosaic_0001>

<bundles_post_ra>
// kernel: conv_dw_1x1.1
= control target key start
LH: loop header
LB: loop body
LE: loop exit
PB: predicated region body
PF: predicated region fallthrough
CT: control target
= control target key end

     0   :  { %s1489_s15 = smov 0   ;;  %s1491_s16 = smov 0   ;;  %s2056_s0 = inlined_call_operand.vmem [shape: f32[2,64,256], index: 0, kind: input, shape index: {}]   ;;  %s2057_s1 = inlined_call_operand.vmem [shape: bf16[256,64], index: 1, kind: input, shape index: {}]   ;;  %s2058_s2 = inlined_call_operand.vmem [shape: f32[256,1], index: 2, kind: input, shape index: {}]   ;;  %s2059_s3 = inlined_call_operand.vmem [shape: f32[256,1], index: 3, kind: input, shape index: {}]   ;;  %s2060_s4 = inlined_call_operand.vmem [shape: f32[2,256,256], index: 4, kind: output, shape index: {}]  }
   0x1   :  { %s1493_s17 = smov 0  }
   0x2 LB: > { %s26_s18 = sadd.s32 1, %s1457_s16  ;;  %p1347_p0 = scmp.ge.s32.totalorder %s1461_s17, 1  ;;  %s1461_s17 = sphi %s1493_s17, %s14_s17   ;;  %s1457_s16 = sphi %s1491_s16, %s2077_s16   ;;  %s1453_s15 = sphi %s1489_s15, %s2076_s15  }
   0x3   : > { %p28_p1 = scmp.ge.s32.totalorder %s26_s18, 2  ;;  %p183_p2 = scmp.lt.s32.totalorder %s1461_s17, 3 }
   0x5   : > { %s2079_s18 = smov (%p28_p1, %s26_s18), 0  ;;  %p184_p3 = pnand %p1347_p0, %p183_p2 }
   0x7   : > { %187 = sbr.rel (%p184_p3) target bundleno = 316 (0x13c), region = 36 }
   0xe   : > { %v618_v0 = vld [vmem:[%s2058_s2 + $0x10] sm:$0xff]  ;;  %v616_v1 = vld [vmem:[%s2058_s2] sm:$0xff]  ;;  %p218_p4 = scmp.lt.s32.totalorder %s1453_s15, 1  ;;  %v1463_v2 = vmov 0   ;;  %v619_v3 = vld [vmem:[%s2058_s2 + $0x18] sm:$0xff]  ;;  %vm374_vm0 = vcmask 523264  }
   0xf   : > { %1422 = vset.pattern.permute.xlu1 %v1463_v2  ;;  %1421 = vset.pattern.permute.xlu0 %v1463_v2  ;;  %v617_v4 = vld [vmem:[%s2058_s2 + $0x8] sm:$0xff]  ;;  %v620_v6 = vld [vmem:[%s2058_s2 + $0x20] sm:$0xff]  ;;  %v623_v20 = vld [vmem:[%s2058_s2 + $0x38] sm:$0xff] }
  0x10   : > { %660 = vperm.xlu1 %1422, %v618_v0   ;;  %650 = vperm.xlu0 %1421, %v616_v1   ;;  %s2081_s15 = smov (!%p218_p4, %s1453_s15), 1  ;;  %v621_v5 = vld [vmem:[%s2058_s2 + $0x28] sm:$0xff]  ;;  %v622_v21 = vld [vmem:[%s2058_s2 + $0x30] sm:$0xff]  ;;  %v624_v29 = vld [vmem:[%s2058_s2 + $0x40] sm:$0xff] }
  0x11   : > { %455 = vmatprep.mubr.bf16.mxu0 %v1463_v2  ;;  %535 = vmatprep.mubr.bf16.mxu1 %v1463_v2  ;;  %s1386_s27 = sshll.u32 %s2081_s15, 7  ;;  %v625_v28 = vld [vmem:[%s2058_s2 + $0x48] sm:$0xff]  ;;  %v627_v34 = vld [vmem:[%s2058_s2 + $0x58] sm:$0xff]  ;;  %v626_v35 = vld [vmem:[%s2058_s2 + $0x50] sm:$0xff]  ;;  %s1387_s29 = sshll.u32 %s2081_s15, 9 }
  0x12   : > { %s1529_s30 = scalar_lea.vmem %s2056_s0, %s1386_s27  ;;  %v1423_v37 = vld [vmem:[%s2057_s1] sm:$0xff]   ;;  %v629_v39 = vld [vmem:[%s2058_s2 + $0x68] sm:$0xff]  ;;  %v631_v41 = vld [vmem:[%s2058_s2 + $0x78] sm:$0xff]  ;;  %s1895_s6 = scalar_lea.vmem %s2060_s4, %s1387_s29 }
  0x13   : > { %v239_v7 = vld [vmem:[%s1529_s30 + $0x8] sm:$0xff]  ;;  %v241_v8 = vld [vmem:[%s1529_s30 + $0x18] sm:$0xff]  ;;  %v238_v9 = vld [vmem:[%s1529_s30] sm:$0xff] }
  0x14   : > { %665 = vperm.xlu1 %1422, %v619_v3   ;;  %655 = vperm.xlu0 %1421, %v617_v4   ;;  %v255_v10 = vpack.c.bf16 %v241_v8, %v239_v7  ;;  %v240_v11 = vld [vmem:[%s1529_s30 + $0x10] sm:$0xff]  ;;  %v243_v12 = vld [vmem:[%s1529_s30 + $0x28] sm:$0xff]  ;;  %v245_v13 = vld [vmem:[%s1529_s30 + $0x38] sm:$0xff] }
  0x15   : > { %v254_v14 = vpack.c.bf16 %v240_v11, %v238_v9  ;;  %v257_v15 = vpack.c.bf16 %v245_v13, %v243_v12  ;;  %v242_v16 = vld [vmem:[%s1529_s30 + $0x20] sm:$0xff]  ;;  %v244_v17 = vld [vmem:[%s1529_s30 + $0x30] sm:$0xff]  ;;  %v247_v18 = vld [vmem:[%s1529_s30 + $0x48] sm:$0xff] }
  0x16   : > { %423 = vmatprep.subr.bf16.mxu0 %v255_v10  ;;  %1388 = vmatprep.subr.bf16.mxu1 %v255_v10  ;;  %v249_v19 = vld [vmem:[%s1529_s30 + $0x58] sm:$0xff]  ;;  %v256_v22 = vpack.c.bf16 %v244_v17, %v242_v16  ;;  %v246_v23 = vld [vmem:[%s1529_s30 + $0x40] sm:$0xff]  ;;  %v248_v25 = vld [vmem:[%s1529_s30 + $0x50] sm:$0xff] }
  0x17   : > { %424 = vmatpush1.bf16.msra.mxu0 %v254_v14  ;;  %1392 = vmatpush1.bf16.msra.mxu1 %v254_v14  ;;  %v259_v24 = vpack.c.bf16 %v249_v19, %v247_v18  ;;  %v251_v26 = vld [vmem:[%s1529_s30 + $0x68] sm:$0xff]  ;;  %v253_v27 = vld [vmem:[%s1529_s30 + $0x78] sm:$0xff]  ;;  %v258_v30 = vpack.c.bf16 %v248_v25, %v246_v23  ;;  %v250_v31 = vld [vmem:[%s1529_s30 + $0x60] sm:$0xff] }
  0x18   : > { %675 = vperm.xlu1 %1422, %v621_v5   ;;  %670 = vperm.xlu0 %1421, %v620_v6   ;;  %v261_v32 = vpack.c.bf16 %v253_v27, %v251_v26  ;;  %v252_v33 = vld [vmem:[%s1529_s30 + $0x70] sm:$0xff]  ;;  %v1424_v38 = vld [vmem:[%s2057_s1 + $0x40] sm:$0xff]   ;;  %v1425_v43 = vld [vmem:[%s2057_s1 + $0x8] sm:$0xff]  }
  0x19   : > { %425 = vmatprep.subr.bf16.mxu0 %v257_v15  ;;  %1389 = vmatprep.subr.bf16.mxu1 %v257_v15  ;;  %v260_v36 = vpack.c.bf16 %v252_v33, %v250_v31  ;;  %v628_v40 = vld [vmem:[%s2058_s2 + $0x60] sm:$0xff]  ;;  %v630_v42 = vld [vmem:[%s2058_s2 + $0x70] sm:$0xff]  ;;  %v1426_v44 = vld [vmem:[%s2057_s1 + $0x48] sm:$0xff]  }
  0x1a   : > { %v633_v45 = vld [vmem:[%s2058_s2 + $0x88] sm:$0xff]  ;;  %v632_v46 = vld [vmem:[%s2058_s2 + $0x80] sm:$0xff]  ;;  %v635_v47 = vld [vmem:[%s2058_s2 + $0x98] sm:$0xff] }
  0x1b   : > { %426 = vmatpush1.bf16.msra.mxu0 %v256_v22  ;;  %1393 = vmatpush1.bf16.msra.mxu1 %v256_v22  ;;  %v634_v48 = vld [vmem:[%s2058_s2 + $0x90] sm:$0xff]  ;;  %v637_v51 = vld [vmem:[%s2058_s2 + $0xa8] sm:$0xff]  ;;  %v636_v52 = vld [vmem:[%s2058_s2 + $0xa0] sm:$0xff] }
  0x1c   : > { %685 = vperm.xlu1 %1422, %v623_v20   ;;  %680 = vperm.xlu0 %1421, %v622_v21   ;;  %v1427_v49 = vld [vmem:[%s2057_s1 + $0x10] sm:$0xff]   ;;  %v639_v53 = vld [vmem:[%s2058_s2 + $0xb8] sm:$0xff]  ;;  %v641_v57 = vld [vmem:[%s2058_s2 + $0xc8] sm:$0xff] }
  0x1d   : > { %427 = vmatprep.subr.bf16.mxu0 %v259_v24  ;;  %1390 = vmatprep.subr.bf16.mxu1 %v259_v24  ;;  %v1428_v50 = vld [vmem:[%s2057_s1 + $0x50] sm:$0xff]   ;;  %v1429_v55 = vld [vmem:[%s2057_s1 + $0x18] sm:$0xff]   ;;  %v640_v58 = vld [vmem:[%s2058_s2 + $0xc0] sm:$0xff] }
  0x1e   : > { %v638_v54 = vld [vmem:[%s2058_s2 + $0xb0] sm:$0xff]  ;;  %v1430_v56 = vld [vmem:[%s2057_s1 + $0x58] sm:$0xff]   ;;  %v1431_v61 = vld [vmem:[%s2057_s1 + $0x20] sm:$0xff]  }
  0x1f   : > { %428 = vmatpush1.bf16.msra.mxu0 %v258_v30  ;;  %1394 = vmatpush1.bf16.msra.mxu1 %v258_v30  ;;  %v643_v59 = vld [vmem:[%s2058_s2 + $0xd8] sm:$0xff]  ;;  %v642_v60 = vld [vmem:[%s2058_s2 + $0xd0] sm:$0xff]  ;;  %v1432_v62 = vld [vmem:[%s2057_s1 + $0x60] sm:$0xff]  }
  0x20   : > { %695 = vperm.xlu1 %1422, %v625_v28   ;;  %690 = vperm.xlu0 %1421, %v624_v29   ;;  %v645_v63 = vld [vmem:[%s2058_s2 + $0xe8] sm:$0xff]  ;;  %v644_v0 = vld [vmem:[%s2058_s2 + $0xe0] sm:$0xff]  ;;  %v647_v1 = vld [vmem:[%s2058_s2 + $0xf8] sm:$0xff] }
  0x21   : > { %429 = vmatprep.subr.bf16.mxu0 %v261_v32  ;;  %1391 = vmatprep.subr.bf16.mxu1 %v261_v32  ;;  %v646_v3 = vld [vmem:[%s2058_s2 + $0xf0] sm:$0xff]  ;;  %v1433_v4 = vld [vmem:[%s2057_s1 + $0x28] sm:$0xff]   ;;  %v872_v7 = vld [vmem:[%s2059_s3] sm:$0xff] }
  0x22   : > { %v1434_v5 = vld [vmem:[%s2057_s1 + $0x68] sm:$0xff]   ;;  %v875_v8 = vld [vmem:[%s2059_s3 + $0x18] sm:$0xff]  ;;  %v874_v9 = vld [vmem:[%s2059_s3 + $0x10] sm:$0xff] }
  0x23   : > { %430 = vmatpush1.bf16.msra.mxu0 %v260_v36  ;;  %1395 = vmatpush1.bf16.msra.mxu1 %v260_v36  ;;  %v873_v6 = vld [vmem:[%s2059_s3 + $0x8] sm:$0xff]  ;;  %v1435_v10 = vld [vmem:[%s2057_s1 + $0x30] sm:$0xff]   ;;  %v876_v13 = vld [vmem:[%s2059_s3 + $0x20] sm:$0xff] }
  0x24   : > { %705 = vperm.xlu1 %1422, %v627_v34   ;;  %700 = vperm.xlu0 %1421, %v626_v35   ;;  %v1436_v11 = vld [vmem:[%s2057_s1 + $0x70] sm:$0xff]   ;;  %v877_v12 = vld [vmem:[%s2059_s3 + $0x28] sm:$0xff]  ;;  %v879_v14 = vld [vmem:[%s2059_s3 + $0x38] sm:$0xff] }
  0x25   : > { %v878_v15 = vld [vmem:[%s2059_s3 + $0x30] sm:$0xff]  ;;  %v1437_v16 = vld [vmem:[%s2057_s1 + $0x38] sm:$0xff]   ;;  %v881_v18 = vld [vmem:[%s2059_s3 + $0x48] sm:$0xff] }
  0x26   : > { %1368 = vmatmul.mubr.msk.bf16.vlgmr.msra.gmra.mrb[0].mxu0 %vm374_vm0, %v1423_v37  ;;  %1376 = vmatmul.mubr.msk.bf16.vlgmr.msra.gmra.mrb[0].mxu1 %vm374_vm0, %v1424_v38  ;;  %v1438_v17 = vld [vmem:[%s2057_s1 + $0x78] sm:$0xff]   ;;  %v880_v19 = vld [vmem:[%s2059_s3 + $0x40] sm:$0xff]  ;;  %v882_v20 = vld [vmem:[%s2059_s3 + $0x50] sm:$0xff] }
  0x27   : > { %465 = vmatprep.mubr.bf16.mxu0 %v1463_v2  ;;  %545 = vmatprep.mubr.bf16.mxu1 %v1463_v2  ;;  %v885_v21 = vld [vmem:[%s2059_s3 + $0x68] sm:$0xff]  ;;  %v884_v22 = vld [vmem:[%s2059_s3 + $0x60] sm:$0xff]  ;;  %v887_v23 = vld [vmem:[%s2059_s3 + $0x78] sm:$0xff] }
  0x28   : > { %715 = vperm.xlu1 %1422, %v629_v39   ;;  %710 = vperm.xlu0 %1421, %v628_v40   ;;  %v886_v24 = vld [vmem:[%s2059_s3 + $0x70] sm:$0xff]  ;;  %v889_v25 = vld [vmem:[%s2059_s3 + $0x88] sm:$0xff]  ;;  %v888_v26 = vld [vmem:[%s2059_s3 + $0x80] sm:$0xff] }
  0x29   : > { %v891_v27 = vld [vmem:[%s2059_s3 + $0x98] sm:$0xff]  ;;  %v890_v28 = vld [vmem:[%s2059_s3 + $0x90] sm:$0xff]  ;;  %v893_v29 = vld [vmem:[%s2059_s3 + $0xa8] sm:$0xff] }
  0x2a   : > { %v892_v30 = vld [vmem:[%s2059_s3 + $0xa0] sm:$0xff]  ;;  %v895_v31 = vld [vmem:[%s2059_s3 + $0xb8] sm:$0xff]  ;;  %v894_v32 = vld [vmem:[%s2059_s3 + $0xb0] sm:$0xff] }
  0x2b   : > { %v897_v33 = vld [vmem:[%s2059_s3 + $0xc8] sm:$0xff]  ;;  %v896_v34 = vld [vmem:[%s2059_s3 + $0xc0] sm:$0xff]  ;;  %v899_v35 = vld [vmem:[%s2059_s3 + $0xd8] sm:$0xff] }
  0x2c   : > { %725 = vperm.xlu1 %1422, %v631_v41   ;;  %720 = vperm.xlu0 %1421, %v630_v42   ;;  %v898_v36 = vld [vmem:[%s2059_s3 + $0xd0] sm:$0xff]  ;;  %v901_v37 = vld [vmem:[%s2059_s3 + $0xe8] sm:$0xff]  ;;  %v900_v38 = vld [vmem:[%s2059_s3 + $0xe0] sm:$0xff] }
  0x2d   : > { %v903_v39 = vld [vmem:[%s2059_s3 + $0xf8] sm:$0xff]  ;;  %v902_v40 = vld [vmem:[%s2059_s3 + $0xf0] sm:$0xff] }
  0x2e   : > { %1369 = vmatmul.mubr.msk.bf16.gmra.mrb[4].mxu0 %vm374_vm0, %v1425_v43  ;;  %1377 = vmatmul.mubr.msk.bf16.gmra.mrb[4].mxu1 %vm374_vm0, %v1426_v44 }
  0x2f   : > { %475 = vmatprep.mubr.bf16.mxu0 %v1463_v2  ;;  %555 = vmatprep.mubr.bf16.mxu1 %v1463_v2 }
  0x30   : > { %735 = vperm.xlu1 %1422, %v633_v45   ;;  %730 = vperm.xlu0 %1421, %v632_v46  }
  0x34   : > { %745 = vperm.xlu1 %1422, %v635_v47   ;;  %740 = vperm.xlu0 %1421, %v634_v48  }
  0x36   : > { %1370 = vmatmul.mubr.msk.bf16.gmra.mrb[8].mxu0 %vm374_vm0, %v1427_v49  ;;  %1378 = vmatmul.mubr.msk.bf16.gmra.mrb[8].mxu1 %vm374_vm0, %v1428_v50 }
  0x37   : > { %485 = vmatprep.mubr.bf16.mxu0 %v1463_v2  ;;  %565 = vmatprep.mubr.bf16.mxu1 %v1463_v2 }
  0x38   : > { %755 = vperm.xlu1 %1422, %v637_v51   ;;  %750 = vperm.xlu0 %1421, %v636_v52  }
  0x3c   : > { %765 = vperm.xlu1 %1422, %v639_v53   ;;  %760 = vperm.xlu0 %1421, %v638_v54  }
  0x3e   : > { %1371 = vmatmul.mubr.msk.bf16.gmra.mrb[12].mxu0 %vm374_vm0, %v1429_v55  ;;  %1379 = vmatmul.mubr.msk.bf16.gmra.mrb[12].mxu1 %vm374_vm0, %v1430_v56 }
  0x3f   : > { %495 = vmatprep.mubr.bf16.mxu0 %v1463_v2  ;;  %575 = vmatprep.mubr.bf16.mxu1 %v1463_v2 }
  0x40   : > { %775 = vperm.xlu1 %1422, %v641_v57   ;;  %770 = vperm.xlu0 %1421, %v640_v58  }
  0x44   : > { %785 = vperm.xlu1 %1422, %v643_v59   ;;  %780 = vperm.xlu0 %1421, %v642_v60  }
  0x46   : > { %1372 = vmatmul.mubr.msk.bf16.gmra.mrb[16].mxu0 %vm374_vm0, %v1431_v61  ;;  %1380 = vmatmul.mubr.msk.bf16.gmra.mrb[16].mxu1 %vm374_vm0, %v1432_v62 }
  0x47   : > { %505 = vmatprep.mubr.bf16.mxu0 %v1463_v2  ;;  %585 = vmatprep.mubr.bf16.mxu1 %v1463_v2 }
  0x48   : > { %795 = vperm.xlu1 %1422, %v645_v63   ;;  %790 = vperm.xlu0 %1421, %v644_v0  }
  0x4c   : > { %805 = vperm.xlu1 %1422, %v647_v1   ;;  %800 = vperm.xlu0 %1421, %v646_v3  }
  0x4e   : > { %1373 = vmatmul.mubr.msk.bf16.gmra.mrb[20].mxu0 %vm374_vm0, %v1433_v4  ;;  %1381 = vmatmul.mubr.msk.bf16.gmra.mrb[20].mxu1 %vm374_vm0, %v1434_v5 }
  0x4f   : > { %515 = vmatprep.mubr.bf16.mxu0 %v1463_v2  ;;  %595 = vmatprep.mubr.bf16.mxu1 %v1463_v2 }
  0x50   : > { %911 = vperm.xlu1 %1422, %v873_v6   ;;  %906 = vperm.xlu0 %1421, %v872_v7  }
  0x54   : > { %921 = vperm.xlu1 %1422, %v875_v8   ;;  %916 = vperm.xlu0 %1421, %v874_v9  }
  0x56   : > { %1374 = vmatmul.mubr.msk.bf16.gmra.mrb[24].mxu0 %vm374_vm0, %v1435_v10  ;;  %1382 = vmatmul.mubr.msk.bf16.gmra.mrb[24].mxu1 %vm374_vm0, %v1436_v11 }
  0x57   : > { %525 = vmatprep.mubr.bf16.mxu0 %v1463_v2  ;;  %605 = vmatprep.mubr.bf16.mxu1 %v1463_v2  ;;  %v883_v2 = vld [vmem:[%s2059_s3 + $0x58] sm:$0xff] }
  0x58   : > { %931 = vperm.xlu1 %1422, %v877_v12   ;;  %926 = vperm.xlu0 %1421, %v876_v13  }
  0x5c   : > { %941 = vperm.xlu1 %1422, %v879_v14   ;;  %936 = vperm.xlu0 %1421, %v878_v15  }
  0x5e   : > { %1375 = vmatmul.mubr.msk.bf16.gmra.mrb[28].mxu0 %vm374_vm0, %v1437_v16  ;;  %1383 = vmatmul.mubr.msk.bf16.gmra.mrb[28].mxu1 %vm374_vm0, %v1438_v17 }
  0x60   : > { %951 = vperm.xlu1 %1422, %v881_v18   ;;  %946 = vperm.xlu0 %1421, %v880_v19  }
  0x64   : > { %961 = vperm.xlu1 %1422, %v883_v2   ;;  %956 = vperm.xlu0 %1421, %v882_v20  }
  0x68   : > { %971 = vperm.xlu1 %1422, %v885_v21   ;;  %966 = vperm.xlu0 %1421, %v884_v22  }
  0x6c   : > { %981 = vperm.xlu1 %1422, %v887_v23   ;;  %976 = vperm.xlu0 %1421, %v886_v24  }
  0x70   : > { %991 = vperm.xlu1 %1422, %v889_v25   ;;  %986 = vperm.xlu0 %1421, %v888_v26  }
  0x74   : > { %1001 = vperm.xlu1 %1422, %v891_v27   ;;  %996 = vperm.xlu0 %1421, %v890_v28  }
  0x78   : > { %1011 = vperm.xlu1 %1422, %v893_v29   ;;  %1006 = vperm.xlu0 %1421, %v892_v30  }
  0x7c   : > { %1021 = vperm.xlu1 %1422, %v895_v31   ;;  %1016 = vperm.xlu0 %1421, %v894_v32  }
  0x80   : > { %1031 = vperm.xlu1 %1422, %v897_v33   ;;  %1026 = vperm.xlu0 %1421, %v896_v34  }
  0x84   : > { %1041 = vperm.xlu1 %1422, %v899_v35   ;;  %1036 = vperm.xlu0 %1421, %v898_v36  }
  0x88   : > { %1051 = vperm.xlu1 %1422, %v901_v37   ;;  %1046 = vperm.xlu0 %1421, %v900_v38  }
  0x8c   : > { %1061 = vperm.xlu1 %1422, %v903_v39   ;;  %1056 = vperm.xlu0 %1421, %v902_v40  }
  0x8f   : > { %v1805_v41 = vpop.permute.xlu1 %660  ;;  %v651_v42 = vpop.permute.xlu0 %650 }
  0x93   : > { %v1807_v43 = vpop.permute.xlu1 %665  ;;  %v1809_v44 = vpop.permute.xlu0 %655 }
  0x97   : > { %v1811_v45 = vpop.permute.xlu1 %675  ;;  %v1813_v46 = vpop.permute.xlu0 %670 }
  0x9b   : > { %v1815_v47 = vpop.permute.xlu1 %685  ;;  %v1817_v48 = vpop.permute.xlu0 %680 }
  0x9f   : > { %v1819_v49 = vpop.permute.xlu1 %695  ;;  %v1821_v50 = vpop.permute.xlu0 %690 }
  0xa3   : > { %v1823_v51 = vpop.permute.xlu1 %705  ;;  %v1825_v52 = vpop.permute.xlu0 %700 }
  0xa7   : > { %v1827_v53 = vpop.permute.xlu1 %715  ;;  %v1829_v54 = vpop.permute.xlu0 %710 }
  0xab   : > { %v1831_v55 = vpop.permute.xlu1 %725  ;;  %v1833_v56 = vpop.permute.xlu0 %720 }
  0xac   : > { %2066 = vst [vmem:[#allocation2_spill] sm:$0xff] %v1831_v55 }
  0xaf   : > { %v736_v57 = vpop.permute.xlu1 %735  ;;  %v731_v58 = vpop.permute.xlu0 %730 }
  0xb3   : > { %v1835_v59 = vpop.permute.xlu1 %745  ;;  %v1837_v60 = vpop.permute.xlu0 %740 }
  0xb7   : > { %v1839_v61 = vpop.permute.xlu1 %755  ;;  %v1841_v62 = vpop.permute.xlu0 %750 }
  0xbb   : > { %v1843_v63 = vpop.permute.xlu1 %765  ;;  %v1845_v0 = vpop.permute.xlu0 %760 }
  0xbf   : > { %v1847_v1 = vpop.permute.xlu1 %775  ;;  %v1849_v3 = vpop.permute.xlu0 %770 }
  0xc3   : > { %v1851_v4 = vpop.permute.xlu1 %785  ;;  %v1853_v5 = vpop.permute.xlu0 %780 }
  0xc7   : > { %v1855_v6 = vpop.permute.xlu1 %795  ;;  %v1857_v7 = vpop.permute.xlu0 %790 }
  0xcb   : > { %v1859_v8 = vpop.permute.xlu1 %805  ;;  %v1861_v9 = vpop.permute.xlu0 %800 }
  0xcc   : > { %2067 = vst [vmem:[#allocation3_spill] sm:$0xff] %v1859_v8  ;;  %2068 = vst [vmem:[#allocation4_spill] sm:$0xff] %v1861_v9 }
  0xcf   : > { %v912_v10 = vpop.permute.xlu1 %911  ;;  %v907_v11 = vpop.permute.xlu0 %906 }
  0xd3   : > { %v1863_v12 = vpop.permute.xlu0 %916  ;;  %v1865_v13 = vpop.permute.xlu1 %921 }
  0xd7   : > { %v1867_v14 = vpop.permute.xlu0 %926  ;;  %v1869_v15 = vpop.permute.xlu1 %931 }
  0xdb   : > { %v1871_v16 = vpop.permute.xlu0 %936  ;;  %v1873_v17 = vpop.permute.xlu1 %941 }
  0xdf   : > { %v1875_v18 = vpop.permute.xlu0 %946  ;;  %v1877_v19 = vpop.permute.xlu1 %951 }
  0xe3   : > { %v1879_v2 = vpop.permute.xlu0 %956  ;;  %v1881_v20 = vpop.permute.xlu1 %961 }
  0xe7   : > { %v1883_v21 = vpop.permute.xlu0 %966  ;;  %v1885_v22 = vpop.permute.xlu1 %971 }
  0xeb   : > { %v1887_v23 = vpop.permute.xlu0 %976  ;;  %v1889_v24 = vpop.permute.xlu1 %981 }
  0xec   : > { %2069 = vst [vmem:[#allocation5_spill] sm:$0xff] %v1887_v23  ;;  %2070 = vst [vmem:[#allocation6_spill] sm:$0xff] %v1889_v24 }
  0xef   : > { %v987_v27 = vpop.permute.xlu0 %986 }
  0xf9   : > { %v457_v25 = vpop.f32.mrb[0].mxu0  ;;  %v537_v26 = vpop.f32.mrb[0].mxu1 }
  0xfa   : > { %v808_v28 = vmul.f32 %v651_v42, %v457_v25  ;;  %v840_v29 = vmul.f32 %v731_v58, %v537_v26  ;;  %v459_v30 = vpop.f32.mrb[1].mxu0  ;;  %v539_v31 = vpop.f32.mrb[1].mxu1 }
  0xfb   : > { %v809_v34 = vmul.f32 %v651_v42, %v459_v30  ;;  %v841_v35 = vmul.f32 %v731_v58, %v539_v31  ;;  %v461_v36 = vpop.f32.mrb[2].mxu0  ;;  %v541_v37 = vpop.f32.mrb[2].mxu1 }
  0xfc   : > { %v1064_v32 = vadd.f32 %v907_v11, %v808_v28  ;;  %v1096_v33 = vadd.f32 %v987_v27, %v840_v29  ;;  %v810_v38 = vmul.f32 %v1809_v44, %v461_v36  ;;  %v842_v39 = vmul.f32 %v736_v57, %v541_v37  ;;  %v463_v40 = vpop.f32.mrb[3].mxu0  ;;  %v543_v25 = vpop.f32.mrb[3].mxu1 }
  0xfd   : > { %v992_v26 = vpop.permute.xlu1 %991  ;;  %v1065_v29 = vadd.f32 %v907_v11, %v809_v34  ;;  %v1097_v42 = vadd.f32 %v987_v27, %v841_v35  ;;  %v811_v31 = vmul.f32 %v1809_v44, %v463_v40  ;;  %v843_v8 = vmul.f32 %v736_v57, %v543_v25  ;;  %v997_v27 = vpop.permute.xlu0 %996 }
  0xfe   : > { %v1128_v24 = vmax.f32 %v1064_v32, 0.0  ;;  %v1160_v28 = vmax.f32 %v1096_v33, 0.0  ;;  %v1066_v58 = vadd.f32 %v912_v10, %v810_v38  ;;  %v1098_v30 = vadd.f32 %v992_v26, %v842_v39 }
  0xff   : > { %v1129_v36 = vmax.f32 %v1065_v29, 0.0  ;;  %v1161_v37 = vmax.f32 %v1097_v42, 0.0  ;;  %v1067_v9 = vadd.f32 %v912_v10, %v811_v31  ;;  %v1099_v32 = vadd.f32 %v992_v26, %v843_v8 }
 0x100   : > { %1192 = vst [vmem:[%s1895_s6] sm:$0xff] %v1128_v24  ;;  %1224 = vst [vmem:[%s1895_s6 + $0x100] sm:$0xff] %v1160_v28  ;;  %v1130_v55 = vmax.f32 %v1066_v58, 0.0  ;;  %v1162_v23 = vmax.f32 %v1098_v30, 0.0 }
 0x101   : > { %v467_v33 = vpop.f32.mrb[4].mxu0  ;;  %v547_v11 = vpop.f32.mrb[4].mxu1  ;;  %1193 = vst [vmem:[%s1895_s6 + $0x8] sm:$0xff] %v1129_v36  ;;  %1225 = vst [vmem:[%s1895_s6 + $0x108] sm:$0xff] %v1161_v37  ;;  %v1131_v24 = vmax.f32 %v1067_v9, 0.0  ;;  %v1163_v34 = vmax.f32 %v1099_v32, 0.0 }
 0x102   : > { %v812_v44 = vmul.f32 %v1805_v41, %v467_v33  ;;  %v844_v57 = vmul.f32 %v1837_v60, %v547_v11  ;;  %1194 = vst [vmem:[%s1895_s6 + $0x10] sm:$0xff] %v1130_v55  ;;  %1226 = vst [vmem:[%s1895_s6 + $0x110] sm:$0xff] %v1162_v23  ;;  %v469_v35 = vpop.f32.mrb[5].mxu0  ;;  %v549_v38 = vpop.f32.mrb[5].mxu1 }
 0x103   : > { %v813_v39 = vmul.f32 %v1805_v41, %v469_v35  ;;  %v845_v40 = vmul.f32 %v1837_v60, %v549_v38  ;;  %v471_v25 = vpop.f32.mrb[6].mxu0  ;;  %v551_v26 = vpop.f32.mrb[6].mxu1  ;;  %1195 = vst [vmem:[%s1895_s6 + $0x18] sm:$0xff] %v1131_v24  ;;  %1227 = vst [vmem:[%s1895_s6 + $0x118] sm:$0xff] %v1163_v34 }
 0x104   : > { %v1068_v10 = vadd.f32 %v1863_v12, %v812_v44  ;;  %v1100_v8 = vadd.f32 %v997_v27, %v844_v57  ;;  %v814_v55 = vmul.f32 %v1807_v43, %v471_v25  ;;  %v846_v9 = vmul.f32 %v1835_v59, %v551_v26  ;;  %v473_v23 = vpop.f32.mrb[7].mxu0  ;;  %v553_v28 = vpop.f32.mrb[7].mxu1 }
 0x105   : > { %v1002_v29 = vpop.permute.xlu1 %1001  ;;  %v1069_v30 = vadd.f32 %v1863_v12, %v813_v39  ;;  %v1101_v41 = vadd.f32 %v997_v27, %v845_v40  ;;  %v815_v36 = vmul.f32 %v1807_v43, %v473_v23  ;;  %v847_v37 = vmul.f32 %v1835_v59, %v553_v28  ;;  %v1007_v34 = vpop.permute.xlu0 %1006 }
 0x106   : > { %v1132_v42 = vmax.f32 %v1068_v10, 0.0  ;;  %v1164_v58 = vmax.f32 %v1100_v8, 0.0  ;;  %v1070_v60 = vadd.f32 %v1865_v13, %v814_v55  ;;  %v1102_v31 = vadd.f32 %v1002_v29, %v846_v9 }
 0x107   : > { %v1133_v32 = vmax.f32 %v1069_v30, 0.0  ;;  %v1165_v33 = vmax.f32 %v1101_v41, 0.0  ;;  %v1071_v12 = vadd.f32 %v1865_v13, %v815_v36  ;;  %v1103_v27 = vadd.f32 %v1002_v29, %v847_v37 }
 0x108   : > { %1196 = vst [vmem:[%s1895_s6 + $0x20] sm:$0xff] %v1132_v42  ;;  %1228 = vst [vmem:[%s1895_s6 + $0x120] sm:$0xff] %v1164_v58  ;;  %v1134_v11 = vmax.f32 %v1070_v60, 0.0  ;;  %v1166_v44 = vmax.f32 %v1102_v31, 0.0 }
 0x109   : > { %v477_v57 = vpop.f32.mrb[8].mxu0  ;;  %v557_v24 = vpop.f32.mrb[8].mxu1  ;;  %1197 = vst [vmem:[%s1895_s6 + $0x28] sm:$0xff] %v1133_v32  ;;  %1229 = vst [vmem:[%s1895_s6 + $0x128] sm:$0xff] %v1165_v33  ;;  %v1135_v35 = vmax.f32 %v1071_v12, 0.0  ;;  %v1167_v38 = vmax.f32 %v1103_v27, 0.0 }
 0x10a   : > { %v816_v43 = vmul.f32 %v1813_v46, %v477_v57  ;;  %v848_v59 = vmul.f32 %v1841_v62, %v557_v24  ;;  %1198 = vst [vmem:[%s1895_s6 + $0x30] sm:$0xff] %v1134_v11  ;;  %1230 = vst [vmem:[%s1895_s6 + $0x130] sm:$0xff] %v1166_v44  ;;  %v479_v10 = vpop.f32.mrb[9].mxu0  ;;  %v559_v8 = vpop.f32.mrb[9].mxu1 }
 0x10b   : > { %v817_v40 = vmul.f32 %v1813_v46, %v479_v10  ;;  %v849_v25 = vmul.f32 %v1841_v62, %v559_v8  ;;  %v481_v26 = vpop.f32.mrb[10].mxu0  ;;  %v561_v55 = vpop.f32.mrb[10].mxu1  ;;  %1199 = vst [vmem:[%s1895_s6 + $0x38] sm:$0xff] %v1135_v35  ;;  %1231 = vst [vmem:[%s1895_s6 + $0x138] sm:$0xff] %v1167_v38 }
 0x10c   : > { %v1072_v13 = vadd.f32 %v1867_v14, %v816_v43  ;;  %v1104_v39 = vadd.f32 %v1007_v34, %v848_v59  ;;  %v818_v9 = vmul.f32 %v1811_v45, %v481_v26  ;;  %v850_v23 = vmul.f32 %v1839_v61, %v561_v55  ;;  %v483_v28 = vpop.f32.mrb[11].mxu0  ;;  %v563_v29 = vpop.f32.mrb[11].mxu1 }
 0x10d   : > { %v1012_v42 = vpop.permute.xlu1 %1011  ;;  %v1073_v41 = vadd.f32 %v1867_v14, %v817_v40  ;;  %v1105_v46 = vadd.f32 %v1007_v34, %v849_v25  ;;  %v819_v31 = vmul.f32 %v1811_v45, %v483_v28  ;;  %v851_v36 = vmul.f32 %v1839_v61, %v563_v29  ;;  %v1017_v37 = vpop.permute.xlu0 %1016 }
 0x10e   : > { %v1136_v58 = vmax.f32 %v1072_v13, 0.0  ;;  %v1168_v30 = vmax.f32 %v1104_v39, 0.0  ;;  %v1074_v62 = vadd.f32 %v1869_v15, %v818_v9  ;;  %v1106_v60 = vadd.f32 %v1012_v42, %v850_v23 }
 0x10f   : > { %v1137_v32 = vmax.f32 %v1073_v41, 0.0  ;;  %v1169_v33 = vmax.f32 %v1105_v46, 0.0  ;;  %v1075_v14 = vadd.f32 %v1869_v15, %v819_v31  ;;  %v1107_v12 = vadd.f32 %v1012_v42, %v851_v36 }
 0x110   : > { %1200 = vst [vmem:[%s1895_s6 + $0x40] sm:$0xff] %v1136_v58  ;;  %1232 = vst [vmem:[%s1895_s6 + $0x140] sm:$0xff] %v1168_v30  ;;  %v1138_v11 = vmax.f32 %v1074_v62, 0.0  ;;  %v1170_v44 = vmax.f32 %v1106_v60, 0.0 }
 0x111   : > { %v487_v27 = vpop.f32.mrb[12].mxu0  ;;  %v567_v57 = vpop.f32.mrb[12].mxu1  ;;  %1201 = vst [vmem:[%s1895_s6 + $0x48] sm:$0xff] %v1137_v32  ;;  %1233 = vst [vmem:[%s1895_s6 + $0x148] sm:$0xff] %v1169_v33  ;;  %v1139_v43 = vmax.f32 %v1075_v14, 0.0  ;;  %v1171_v59 = vmax.f32 %v1107_v12, 0.0 }
 0x112   : > { %v820_v45 = vmul.f32 %v1817_v48, %v487_v27  ;;  %v852_v61 = vmul.f32 %v1845_v0, %v567_v57  ;;  %v489_v24 = vpop.f32.mrb[13].mxu0  ;;  %v569_v34 = vpop.f32.mrb[13].mxu1  ;;  %1202 = vst [vmem:[%s1895_s6 + $0x50] sm:$0xff] %v1138_v11  ;;  %1234 = vst [vmem:[%s1895_s6 + $0x150] sm:$0xff] %v1170_v44 }
 0x113   : > { %v821_v35 = vmul.f32 %v1817_v48, %v489_v24  ;;  %v853_v15 = vmul.f32 %v1845_v0, %v569_v34  ;;  %v491_v38 = vpop.f32.mrb[14].mxu0  ;;  %v571_v10 = vpop.f32.mrb[14].mxu1  ;;  %1203 = vst [vmem:[%s1895_s6 + $0x58] sm:$0xff] %v1139_v43  ;;  %1235 = vst [vmem:[%s1895_s6 + $0x158] sm:$0xff] %v1171_v59 }
 0x114   : > { %v1076_v8 = vadd.f32 %v1871_v16, %v820_v45  ;;  %v1108_v13 = vadd.f32 %v1017_v37, %v852_v61  ;;  %v822_v39 = vmul.f32 %v1815_v47, %v491_v38  ;;  %v854_v40 = vmul.f32 %v1843_v63, %v571_v10  ;;  %v493_v25 = vpop.f32.mrb[15].mxu0  ;;  %v573_v26 = vpop.f32.mrb[15].mxu1 }
 0x115   : > { %v1022_v55 = vpop.permute.xlu1 %1021  ;;  %v1077_v48 = vadd.f32 %v1871_v16, %v821_v35  ;;  %v1109_v9 = vadd.f32 %v1017_v37, %v853_v15  ;;  %v823_v0 = vmul.f32 %v1815_v47, %v493_v25  ;;  %v855_v23 = vmul.f32 %v1843_v63, %v573_v26  ;;  %v1027_v16 = vpop.permute.xlu0 %1026 }
 0x116   : > { %v1140_v28 = vmax.f32 %v1076_v8, 0.0  ;;  %v1172_v29 = vmax.f32 %v1108_v13, 0.0  ;;  %v1078_v42 = vadd.f32 %v1873_v17, %v822_v39  ;;  %v1110_v58 = vadd.f32 %v1022_v55, %v854_v40 }
 0x117   : > { %v1141_v30 = vmax.f32 %v1077_v48, 0.0  ;;  %v1173_v41 = vmax.f32 %v1109_v9, 0.0  ;;  %v1079_v46 = vadd.f32 %v1873_v17, %v823_v0  ;;  %v1111_v62 = vadd.f32 %v1022_v55, %v855_v23 }
 0x118   : > { %1204 = vst [vmem:[%s1895_s6 + $0x60] sm:$0xff] %v1140_v28  ;;  %1236 = vst [vmem:[%s1895_s6 + $0x160] sm:$0xff] %v1172_v29  ;;  %v1142_v47 = vmax.f32 %v1078_v42, 0.0  ;;  %v1174_v60 = vmax.f32 %v1110_v58, 0.0 }
 0x119   : > { %1205 = vst [vmem:[%s1895_s6 + $0x68] sm:$0xff] %v1141_v30  ;;  %1237 = vst [vmem:[%s1895_s6 + $0x168] sm:$0xff] %v1173_v41  ;;  %v1143_v63 = vmax.f32 %v1079_v46, 0.0  ;;  %v1175_v31 = vmax.f32 %v1111_v62, 0.0  ;;  %v497_v36 = vpop.f32.mrb[16].mxu0  ;;  %v577_v37 = vpop.f32.mrb[16].mxu1 }
 0x11a   : > { %1206 = vst [vmem:[%s1895_s6 + $0x70] sm:$0xff] %v1142_v47  ;;  %1238 = vst [vmem:[%s1895_s6 + $0x170] sm:$0xff] %v1174_v60  ;;  %v824_v32 = vmul.f32 %v1821_v50, %v497_v36  ;;  %v856_v17 = vmul.f32 %v1849_v3, %v577_v37  ;;  %v499_v33 = vpop.f32.mrb[17].mxu0  ;;  %v579_v11 = vpop.f32.mrb[17].mxu1 }
 0x11b   : > { %1207 = vst [vmem:[%s1895_s6 + $0x78] sm:$0xff] %v1143_v63  ;;  %1239 = vst [vmem:[%s1895_s6 + $0x178] sm:$0xff] %v1175_v31  ;;  %v825_v44 = vmul.f32 %v1821_v50, %v499_v33  ;;  %v857_v14 = vmul.f32 %v1849_v3, %v579_v11  ;;  %v501_v12 = vpop.f32.mrb[18].mxu0  ;;  %v581_v27 = vpop.f32.mrb[18].mxu1 }
 0x11c   : > { %v1080_v57 = vadd.f32 %v1875_v18, %v824_v32  ;;  %v1112_v45 = vadd.f32 %v1027_v16, %v856_v17  ;;  %v826_v61 = vmul.f32 %v1819_v49, %v501_v12  ;;  %v858_v24 = vmul.f32 %v1847_v1, %v581_v27  ;;  %v503_v34 = vpop.f32.mrb[19].mxu0  ;;  %v583_v43 = vpop.f32.mrb[19].mxu1 }
 0x11d   : > { %v1032_v59 = vpop.permute.xlu1 %1031  ;;  %v1081_v35 = vadd.f32 %v1875_v18, %v825_v44  ;;  %v1113_v15 = vadd.f32 %v1027_v16, %v857_v14  ;;  %v827_v50 = vmul.f32 %v1819_v49, %v503_v34  ;;  %v859_v3 = vmul.f32 %v1847_v1, %v583_v43  ;;  %v1037_v18 = vpop.permute.xlu0 %1036 }
 0x11e   : > { %v1144_v38 = vmax.f32 %v1080_v57, 0.0  ;;  %v1176_v10 = vmax.f32 %v1112_v45, 0.0  ;;  %v1082_v8 = vadd.f32 %v1877_v19, %v826_v61  ;;  %v1114_v13 = vadd.f32 %v1032_v59, %v858_v24 }
 0x11f   : > { %v1145_v39 = vmax.f32 %v1081_v35, 0.0  ;;  %v1177_v40 = vmax.f32 %v1113_v15, 0.0  ;;  %v1083_v25 = vadd.f32 %v1877_v19, %v827_v50  ;;  %v1115_v26 = vadd.f32 %v1032_v59, %v859_v3 }
 0x120   : > { %1208 = vst [vmem:[%s1895_s6 + $0x80] sm:$0xff] %v1144_v38  ;;  %1240 = vst [vmem:[%s1895_s6 + $0x180] sm:$0xff] %v1176_v10  ;;  %v1146_v49 = vmax.f32 %v1082_v8, 0.0  ;;  %v1178_v55 = vmax.f32 %v1114_v13, 0.0 }
 0x121   : > { %1209 = vst [vmem:[%s1895_s6 + $0x88] sm:$0xff] %v1145_v39  ;;  %1241 = vst [vmem:[%s1895_s6 + $0x188] sm:$0xff] %v1177_v40  ;;  %v1147_v1 = vmax.f32 %v1083_v25, 0.0  ;;  %v1179_v48 = vmax.f32 %v1115_v26, 0.0  ;;  %v507_v9 = vpop.f32.mrb[20].mxu0  ;;  %v587_v0 = vpop.f32.mrb[20].mxu1 }
 0x122   : > { %1210 = vst [vmem:[%s1895_s6 + $0x90] sm:$0xff] %v1146_v49  ;;  %1242 = vst [vmem:[%s1895_s6 + $0x190] sm:$0xff] %v1178_v55  ;;  %v828_v23 = vmul.f32 %v1825_v52, %v507_v9  ;;  %v860_v19 = vmul.f32 %v1853_v5, %v587_v0  ;;  %v509_v28 = vpop.f32.mrb[21].mxu0  ;;  %v589_v29 = vpop.f32.mrb[21].mxu1 }
 0x123   : > { %1211 = vst [vmem:[%s1895_s6 + $0x98] sm:$0xff] %v1147_v1  ;;  %1243 = vst [vmem:[%s1895_s6 + $0x198] sm:$0xff] %v1179_v48  ;;  %v829_v42 = vmul.f32 %v1825_v52, %v509_v28  ;;  %v861_v58 = vmul.f32 %v1853_v5, %v589_v29  ;;  %v511_v30 = vpop.f32.mrb[22].mxu0  ;;  %v591_v41 = vpop.f32.mrb[22].mxu1 }
 0x124   : > { %v1084_v46 = vadd.f32 %v1879_v2, %v828_v23  ;;  %v1116_v62 = vadd.f32 %v1037_v18, %v860_v19  ;;  %v830_v16 = vmul.f32 %v1823_v51, %v511_v30  ;;  %v862_v47 = vmul.f32 %v1851_v4, %v591_v41  ;;  %v513_v60 = vpop.f32.mrb[23].mxu0  ;;  %v593_v63 = vpop.f32.mrb[23].mxu1  ;;  %v2071_v41 = vld [vmem:[#allocation4_spill] sm:$0xff] }
 0x125   : > { %v1042_v31 = vpop.permute.xlu1 %1041  ;;  %v1085_v36 = vadd.f32 %v1879_v2, %v829_v42  ;;  %v1117_v37 = vadd.f32 %v1037_v18, %v861_v58  ;;  %v831_v52 = vmul.f32 %v1823_v51, %v513_v60  ;;  %v863_v5 = vmul.f32 %v1851_v4, %v593_v63  ;;  %v1047_v2 = vpop.permute.xlu0 %1046 }
 0x126   : > { %v1148_v32 = vmax.f32 %v1084_v46, 0.0  ;;  %v1180_v17 = vmax.f32 %v1116_v62, 0.0  ;;  %v1086_v33 = vadd.f32 %v1881_v20, %v830_v16  ;;  %v1118_v11 = vadd.f32 %v1042_v31, %v862_v47 }
 0x127   : > { %v1149_v44 = vmax.f32 %v1085_v36, 0.0  ;;  %v1181_v14 = vmax.f32 %v1117_v37, 0.0  ;;  %v1087_v12 = vadd.f32 %v1881_v20, %v831_v52  ;;  %v1119_v27 = vadd.f32 %v1042_v31, %v863_v5  ;;  %v2072_v31 = vld [vmem:[#allocation5_spill] sm:$0xff]  ;;  %v2073_v52 = vld [vmem:[#allocation2_spill] sm:$0xff] }
 0x128   : > { %1212 = vst [vmem:[%s1895_s6 + $0xa0] sm:$0xff] %v1148_v32  ;;  %1244 = vst [vmem:[%s1895_s6 + $0x1a0] sm:$0xff] %v1180_v17  ;;  %v1150_v51 = vmax.f32 %v1086_v33, 0.0  ;;  %v1182_v57 = vmax.f32 %v1118_v11, 0.0  ;;  %v2074_v32 = vld [vmem:[#allocation3_spill] sm:$0xff] }
 0x129   : > { %1213 = vst [vmem:[%s1895_s6 + $0xa8] sm:$0xff] %v1149_v44  ;;  %1245 = vst [vmem:[%s1895_s6 + $0x1a8] sm:$0xff] %v1181_v14  ;;  %v1151_v4 = vmax.f32 %v1087_v12, 0.0  ;;  %v1183_v45 = vmax.f32 %v1119_v27, 0.0  ;;  %v517_v61 = vpop.f32.mrb[24].mxu0  ;;  %v597_v24 = vpop.f32.mrb[24].mxu1 }
 0x12a   : > { %1214 = vst [vmem:[%s1895_s6 + $0xb0] sm:$0xff] %v1150_v51  ;;  %1246 = vst [vmem:[%s1895_s6 + $0x1b0] sm:$0xff] %v1182_v57  ;;  %v832_v34 = vmul.f32 %v1829_v54, %v517_v61  ;;  %v864_v20 = vmul.f32 %v1857_v7, %v597_v24  ;;  %v519_v43 = vpop.f32.mrb[25].mxu0  ;;  %v599_v59 = vpop.f32.mrb[25].mxu1  ;;  %v2075_v57 = vld [vmem:[#allocation6_spill] sm:$0xff] }
 0x12b   : > { %1215 = vst [vmem:[%s1895_s6 + $0xb8] sm:$0xff] %v1151_v4  ;;  %1247 = vst [vmem:[%s1895_s6 + $0x1b8] sm:$0xff] %v1183_v45  ;;  %v833_v35 = vmul.f32 %v1829_v54, %v519_v43  ;;  %v865_v15 = vmul.f32 %v1857_v7, %v599_v59  ;;  %v521_v50 = vpop.f32.mrb[26].mxu0  ;;  %v601_v3 = vpop.f32.mrb[26].mxu1 }
 0x12c   : > { %v1088_v38 = vadd.f32 %v1883_v21, %v832_v34  ;;  %v1120_v10 = vadd.f32 %v1047_v2, %v864_v20  ;;  %v834_v8 = vmul.f32 %v1827_v53, %v521_v50  ;;  %v866_v13 = vmul.f32 %v1855_v6, %v601_v3  ;;  %v523_v39 = vpop.f32.mrb[27].mxu0  ;;  %v603_v40 = vpop.f32.mrb[27].mxu1 }
 0x12d   : > { %v1052_v25 = vpop.permute.xlu1 %1051  ;;  %v1089_v26 = vadd.f32 %v1883_v21, %v833_v35  ;;  %v1121_v18 = vadd.f32 %v1047_v2, %v865_v15  ;;  %v835_v54 = vmul.f32 %v1827_v53, %v523_v39  ;;  %v867_v7 = vmul.f32 %v1855_v6, %v603_v40  ;;  %v1057_v21 = vpop.permute.xlu0 %1056 }
 0x12e   : > { %v1152_v49 = vmax.f32 %v1088_v38, 0.0  ;;  %v1184_v55 = vmax.f32 %v1120_v10, 0.0  ;;  %v1090_v1 = vadd.f32 %v1885_v22, %v834_v8  ;;  %v1122_v48 = vadd.f32 %v1052_v25, %v866_v13 }
 0x12f   : > { %v1153_v9 = vmax.f32 %v1089_v26, 0.0  ;;  %v1185_v0 = vmax.f32 %v1121_v18, 0.0  ;;  %v1091_v23 = vadd.f32 %v1885_v22, %v835_v54  ;;  %v1123_v19 = vadd.f32 %v1052_v25, %v867_v7 }
 0x130   : > { %1216 = vst [vmem:[%s1895_s6 + $0xc0] sm:$0xff] %v1152_v49  ;;  %1248 = vst [vmem:[%s1895_s6 + $0x1c0] sm:$0xff] %v1184_v55  ;;  %v1154_v53 = vmax.f32 %v1090_v1, 0.0  ;;  %v1186_v28 = vmax.f32 %v1122_v48, 0.0 }
 0x131   : > { %1217 = vst [vmem:[%s1895_s6 + $0xc8] sm:$0xff] %v1153_v9  ;;  %1249 = vst [vmem:[%s1895_s6 + $0x1c8] sm:$0xff] %v1185_v0  ;;  %v1155_v6 = vmax.f32 %v1091_v23, 0.0  ;;  %v1187_v29 = vmax.f32 %v1123_v19, 0.0  ;;  %v527_v42 = vpop.f32.mrb[28].mxu0  ;;  %v607_v58 = vpop.f32.mrb[28].mxu1 }
 0x132   : > { %1218 = vst [vmem:[%s1895_s6 + $0xd0] sm:$0xff] %v1154_v53  ;;  %1250 = vst [vmem:[%s1895_s6 + $0x1d0] sm:$0xff] %v1186_v28  ;;  %v836_v30 = vmul.f32 %v1833_v56, %v527_v42  ;;  %v868_v22 = vmul.f32 %v2071_v41, %v607_v58  ;;  %v529_v46 = vpop.f32.mrb[29].mxu0  ;;  %v609_v62 = vpop.f32.mrb[29].mxu1 }
 0x133   : > { %1219 = vst [vmem:[%s1895_s6 + $0xd8] sm:$0xff] %v1155_v6  ;;  %1251 = vst [vmem:[%s1895_s6 + $0x1d8] sm:$0xff] %v1187_v29  ;;  %v837_v16 = vmul.f32 %v1833_v56, %v529_v46  ;;  %v869_v47 = vmul.f32 %v2071_v41, %v609_v62  ;;  %v531_v60 = vpop.f32.mrb[30].mxu0  ;;  %v611_v63 = vpop.f32.mrb[30].mxu1 }
 0x134   : > { %v1092_v36 = vadd.f32 %v2072_v31, %v836_v30  ;;  %v1124_v37 = vadd.f32 %v1057_v21, %v868_v22  ;;  %v838_v5 = vmul.f32 %v2073_v52, %v531_v60  ;;  %v870_v17 = vmul.f32 %v2074_v32, %v611_v63  ;;  %v533_v33 = vpop.f32.mrb[31].mxu0  ;;  %v613_v11 = vpop.f32.mrb[31].mxu1 }
 0x135   : > { %v1062_v44 = vpop.permute.xlu1 %1061  ;;  %v1093_v14 = vadd.f32 %v2072_v31, %v837_v16  ;;  %v1125_v56 = vadd.f32 %v1057_v21, %v869_v47  ;;  %v839_v12 = vmul.f32 %v2073_v52, %v533_v33  ;;  %v871_v27 = vmul.f32 %v2074_v32, %v613_v11 }
 0x136   : > { %v1156_v2 = vmax.f32 %v1092_v36, 0.0  ;;  %v1188_v51 = vmax.f32 %v1124_v37, 0.0  ;;  %v1094_v4 = vadd.f32 %v2075_v57, %v838_v5  ;;  %v1126_v45 = vadd.f32 %v1062_v44, %v870_v17 }
 0x137   : > { %v1157_v61 = vmax.f32 %v1093_v14, 0.0  ;;  %v1189_v24 = vmax.f32 %v1125_v56, 0.0  ;;  %v1095_v34 = vadd.f32 %v2075_v57, %v839_v12  ;;  %v1127_v20 = vadd.f32 %v1062_v44, %v871_v27 }
 0x138   : > { %1220 = vst [vmem:[%s1895_s6 + $0xe0] sm:$0xff] %v1156_v2  ;;  %1252 = vst [vmem:[%s1895_s6 + $0x1e0] sm:$0xff] %v1188_v51  ;;  %v1158_v43 = vmax.f32 %v1094_v4, 0.0  ;;  %v1190_v59 = vmax.f32 %v1126_v45, 0.0 }
 0x139   : > { %1221 = vst [vmem:[%s1895_s6 + $0xe8] sm:$0xff] %v1157_v61  ;;  %1253 = vst [vmem:[%s1895_s6 + $0x1e8] sm:$0xff] %v1189_v24  ;;  %v1159_v35 = vmax.f32 %v1095_v34, 0.0  ;;  %v1191_v15 = vmax.f32 %v1127_v20, 0.0 }
 0x13a   : > { %1222 = vst [vmem:[%s1895_s6 + $0xf0] sm:$0xff] %v1158_v43  ;;  %1254 = vst [vmem:[%s1895_s6 + $0x1f0] sm:$0xff] %v1190_v59 }
 0x13b   : > { %1223 = vst [vmem:[%s1895_s6 + $0xf8] sm:$0xff] %v1159_v35  ;;  %1255 = vst [vmem:[%s1895_s6 + $0x1f8] sm:$0xff] %v1191_v15 }
 0x13c PF: > { %s14_s17 = sadd.s32 1, %s1461_s17   ;;  %s2076_s15 = smov %s1457_s16 }
 0x13d   : > { %p11_p5 = scmp.ge.s32.totalorder %s14_s17, 4   ;;  %s2077_s16 = smov %s2079_s18 }
 0x13f   :  { %13 = sbr.rel (!%p11_p5) target bundleno = 2 (0x2), region = 66 }

</bundles_post_ra>
